<compile_context>
chip_gen: v6e
topology: v6e:2x2x1
jax: 0.10.0
libtpu: 0.0.40
codegen_flags: <defaults>
</compile_context>

<pallas_src>
import functools

import jax
import jax.numpy as jnp
from jax.experimental import pallas as pl
from jax.experimental.pallas import tpu as pltpu

Nr = 16
NrRF = 2
_EPS = 1e-5

_IN_DIM = 256                                           # PHI_WRF input features
_REAL_DIMS = [(256, 128), (128, 128), (128, 64), (64, Nr * NrRF)]
_PAD = 128                                              # lane-dense padded layer width


def _round_up(v, m):
    return (v + m - 1) // m * m


# --------------------------------- kernels ----------------------------------


def _accum_stats(z, stats_ref, *, tile_rows, valid_rows, padded_rows):
    """Accumulate per-feature [sum; sum-of-squares] of z into stats_ref (2, D)."""
    if padded_rows != valid_rows:                       # static: mask padded batch rows
        rows = (jax.lax.broadcasted_iota(jnp.int32, z.shape, 0)
                + pl.program_id(0) * tile_rows)
        z = jnp.where(rows < valid_rows, z, 0.0)
    upd = jnp.concatenate(
        [jnp.sum(z, axis=0, keepdims=True),
         jnp.sum(z * z, axis=0, keepdims=True)], axis=0)

    @pl.when(pl.program_id(0) == 0)
    def _():
        stats_ref[...] = jnp.zeros_like(stats_ref)

    stats_ref[...] += upd


def _in_matmul_kernel(x_ref, w_ref, z_ref, stats_ref, *,
                      tile_rows, valid_rows, padded_rows):
    """Layer-1 matmul (bf16 x bf16 -> f32) + stats of its pre-BN output."""
    z = jnp.dot(x_ref[...], w_ref[...], preferred_element_type=jnp.float32)
    z_ref[...] = z
    _accum_stats(z, stats_ref, tile_rows=tile_rows,
                 valid_rows=valid_rows, padded_rows=padded_rows)


def _norm_matmul_kernel(ss_ref, zin_ref, w_ref, zout_ref, stats_ref, *,
                        tile_rows, valid_rows, padded_rows):
    """Folded BN (scale/shift) + ReLU of previous layer, next matmul, next stats."""
    ss = ss_ref[...]                                    # (2, D): [scale; shift], f32
    h = jnp.maximum(zin_ref[...] * ss[0:1, :] + ss[1:2, :], 0.0)
    z = jnp.dot(h.astype(jnp.bfloat16), w_ref[...],
                preferred_element_type=jnp.float32)
    zout_ref[...] = z
    _accum_stats(z, stats_ref, tile_rows=tile_rows,
                 valid_rows=valid_rows, padded_rows=padded_rows)


def _norm_tanh_kernel(ss_ref, zin_ref, o_ref):
    """Final BN + SigmPHI:  pi*(2*sigmoid(u)-1) == pi*tanh(u/2)  (single EUP op)."""
    ss = ss_ref[...]
    u = zin_ref[...] * ss[0:1, :] + ss[1:2, :]
    o_ref[...] = jnp.pi * jnp.tanh(0.5 * u)


# ---------------------------- pallas_call wrappers ---------------------------


def _stats_out_specs(b_tile, d_out):
    return (pl.BlockSpec((b_tile, d_out), lambda i: (i, 0)),   # next pre-BN activations
            pl.BlockSpec((2, d_out), lambda i: (0, 0)))        # batch-resident stats acc


def _call_in_matmul(x_bf16, w, *, b_tile, valid_rows):
    n_pad = x_bf16.shape[0]
    kern = functools.partial(_in_matmul_kernel, tile_rows=b_tile,
                             valid_rows=valid_rows, padded_rows=n_pad)
    return pl.pallas_call(
        kern,
        grid=(n_pad // b_tile,),
        in_specs=[pl.BlockSpec((b_tile, _IN_DIM), lambda i: (i, 0)),
                  pl.BlockSpec((_IN_DIM, _PAD), lambda i: (0, 0))],
        out_specs=_stats_out_specs(b_tile, _PAD),
        out_shape=(jax.ShapeDtypeStruct((n_pad, _PAD), jnp.float32),
                   jax.ShapeDtypeStruct((2, _PAD), jnp.float32)),
        compiler_params=pltpu.CompilerParams(
            dimension_semantics=("arbitrary",)),       # stats output revisited per tile
    )(x_bf16, w)


def _call_norm_matmul(ss, z_in, w, *, b_tile, valid_rows):
    n_pad = z_in.shape[0]
    kern = functools.partial(_norm_matmul_kernel, tile_rows=b_tile,
                             valid_rows=valid_rows, padded_rows=n_pad)
    return pl.pallas_call(
        kern,
        grid=(n_pad // b_tile,),
        in_specs=[pl.BlockSpec((2, _PAD), lambda i: (0, 0)),
                  pl.BlockSpec((b_tile, _PAD), lambda i: (i, 0)),
                  pl.BlockSpec((_PAD, _PAD), lambda i: (0, 0))],
        out_specs=_stats_out_specs(b_tile, _PAD),
        out_shape=(jax.ShapeDtypeStruct((n_pad, _PAD), jnp.float32),
                   jax.ShapeDtypeStruct((2, _PAD), jnp.float32)),
        compiler_params=pltpu.CompilerParams(
            dimension_semantics=("arbitrary",)),
    )(ss, z_in, w)


def _call_norm_tanh(ss, z_in, *, b_tile):
    n_pad = z_in.shape[0]
    return pl.pallas_call(
        _norm_tanh_kernel,
        grid=(n_pad // b_tile,),
        in_specs=[pl.BlockSpec((2, _PAD), lambda i: (0, 0)),
                  pl.BlockSpec((b_tile, _PAD), lambda i: (i, 0))],
        out_specs=pl.BlockSpec((b_tile, _PAD), lambda i: (i, 0)),
        out_shape=jax.ShapeDtypeStruct((n_pad, _PAD), jnp.float32),
        compiler_params=pltpu.CompilerParams(
            dimension_semantics=("parallel",)),        # independent tiles -> megacore
    )(ss, z_in)


# ------------------------------- forward pass --------------------------------


def _pad_weight(w):
    fan_in, fan_out = w.shape
    pad_in = _IN_DIM if fan_in == _IN_DIM else _PAD
    wp = jnp.zeros((pad_in, _PAD), jnp.float32).at[:fan_in, :fan_out].set(w)
    return wp.astype(jnp.bfloat16)


def _pad_vec(v):
    return jnp.zeros((_PAD,), jnp.float32).at[: v.shape[0]].set(v)


def _scale_shift(stats, gamma, beta, n_valid):
    """Fold batch mean/var and gamma/beta into one per-feature scale & shift (f32)."""
    mean = stats[0] / n_valid
    var = jnp.maximum(stats[1] / n_valid - mean * mean, 0.0)
    scale = gamma * jax.lax.rsqrt(var + _EPS)
    shift = beta - mean * scale
    return jnp.stack([scale, shift], axis=0)            # (2, _PAD)


@functools.partial(jax.jit, static_argnames=("b_tile",))
def phi_wrf_forward(x, params, b_tile=512):
    """params: 4 tuples (W[in,out], b[out], gamma[out], beta[out]) in real shapes."""
    n = x.shape[0]
    if n <= b_tile:
        b_tile = _round_up(n, 16)           # single tile covering the (padded) batch
    else:
        b_tile = _round_up(b_tile, 16)      # bf16 sublane-packed tile rows
    n_pad = _round_up(n, b_tile)

    # bf16 input (halves HBM traffic of the dominant byte stream); zero-padded rows.
    xp = jnp.zeros((n_pad, _IN_DIM), jnp.bfloat16).at[:n].set(x.astype(jnp.bfloat16))

    ws = [_pad_weight(p[0]) for p in params]            # bf16, lane-dense padded
    gbs = [(_pad_vec(p[2]), _pad_vec(p[3])) for p in params]
    # NOTE: linear biases params[i][1] are intentionally unused in the kernels:
    # train-mode BatchNorm subtracts the batch mean, which cancels any per-feature
    # constant shift exactly.

    z, stats = _call_in_matmul(xp, ws[0], b_tile=b_tile, valid_rows=n)
    for layer in range(1, 4):
        ss = _scale_shift(stats, *gbs[layer - 1], n)
        z, stats = _call_norm_matmul(ss, z, ws[layer], b_tile=b_tile, valid_rows=n)
    ss = _scale_shift(stats, *gbs[3], n)
    out = _call_norm_tanh(ss, z, b_tile=b_tile)
    return out[:n, : Nr * NrRF]


# --------------------------- params & pure-JAX reference ---------------------


def make_params(key):
    """Deterministic synthetic parameters (PyTorch-like fan_in Linear init)."""
    params = []
    keys = jax.random.split(key, 4 * len(_REAL_DIMS))
    for i, (fan_in, fan_out) in enumerate(_REAL_DIMS):
        kw, kb, kg, ke = keys[4 * i: 4 * i + 4]
        bound = 1.0 / float(fan_in) ** 0.5
        w = jax.random.uniform(kw, (fan_in, fan_out), minval=-bound, maxval=bound,
                               dtype=jnp.float32)
        b = jax.random.uniform(kb, (fan_out,), minval=-bound, maxval=bound,
                               dtype=jnp.float32)
        gamma = 1.0 + 0.2 * jax.random.normal(kg, (fan_out,), dtype=jnp.float32)
        beta = 0.1 * jax.random.normal(ke, (fan_out,), dtype=jnp.float32)
        params.append((w, b, gamma, beta))
    return params


def phi_wrf_reference(x, params):
    """Pure-JAX reference (same matmul precision: bf16 operands, f32 accumulation)."""
    h = x
    for i, (w, b, g, be) in enumerate(params):
        z = jnp.dot(h.astype(jnp.bfloat16), w.astype(jnp.bfloat16),
                    preferred_element_type=jnp.float32) + b
        mu = jnp.mean(z, axis=0, keepdims=True)
        var = jnp.mean((z - mu) ** 2, axis=0, keepdims=True)
        h = (z - mu) * jax.lax.rsqrt(var + _EPS) * g + be
        if i < 3:
            h = jnp.maximum(h, 0.0)
    return jnp.pi * (2.0 / (1.0 + jnp.exp(-h)) - 1.0)


if __name__ == "__main__":
    key = jax.random.PRNGKey(0)
    kx, kp = jax.random.split(key)
    BATCH = 200                 # not a multiple of the test tile -> exercises pad + mask
    x = jax.random.normal(kx, (BATCH, _IN_DIM), dtype=jnp.float32)
    params = make_params(kp)

    out = phi_wrf_forward(x, params, b_tile=64)   # 4 batch tiles (pads 200 -> 256 rows)
    out = jax.block_until_ready(out)

    ref = phi_wrf_reference(x, params)
    assert out.shape == (BATCH, Nr * NrRF)
    err = float(jnp.max(jnp.abs(out - ref)))
    # Both pipelines use bf16 matmul operands with f32 accumulation and f32 BN math;
    # a few 1e-2 absolute on the (-pi, pi) output is the expected bf16 rounding scale.
    assert err < 5e-2, f"max abs err {err}"
    print("KERNEL_OK")
</pallas_src>

<mosaic_0001>
module attributes {stable_mosaic.version = 11 : i64} {
  func.func @_in_matmul_kernel(%arg0: i32, %arg1: memref<64x256xbf16, #tpu.memory_space<vmem>>, %arg2: memref<256x128xbf16, #tpu.memory_space<vmem>>, %arg3: memref<64x128xf32, #tpu.memory_space<vmem>>, %arg4: memref<2x128xf32, #tpu.memory_space<vmem>>) attributes {dimension_semantics = [#tpu.dimension_semantics<arbitrary>], iteration_bounds = array<i64: 4>, scalar_prefetch = 0 : i64, scratch_operands = 0 : i64, tpu.core_type = #tpu.core_type<tc>, window_params = [{transform_indices = @transform_0, window_bounds = array<i64: 64, 256>}, {pipeline_mode = #tpu.pipeline_mode<synchronous>, transform_indices = @transform_1, window_bounds = array<i64: 256, 128>}, {transform_indices = @transform_2, window_bounds = array<i64: 64, 128>}, {pipeline_mode = #tpu.pipeline_mode<synchronous>, transform_indices = @transform_3, window_bounds = array<i64: 2, 128>}]} {
    %c0 = arith.constant 0 : index
    %c0_0 = arith.constant 0 : index
    %0 = vector.load %arg1[%c0, %c0_0] : memref<64x256xbf16, #tpu.memory_space<vmem>>, vector<64x256xbf16>
    %c0_1 = arith.constant 0 : index
    %c0_2 = arith.constant 0 : index
    %1 = vector.load %arg2[%c0_1, %c0_2] : memref<256x128xbf16, #tpu.memory_space<vmem>>, vector<256x128xbf16>
    %cst = arith.constant dense<0.000000e+00> : vector<64x128xf32>
    %2 = tpu.matmul %0, %1, %cst {dimension_numbers = #tpu.dot_dimension_numbers<[1], [0], [0], [1], [0, 0, 1, 1], [], []>} : vector<64x256xbf16>, vector<256x128xbf16>, vector<64x128xf32> -> vector<64x128xf32>
    %c0_3 = arith.constant 0 : index
    %c0_4 = arith.constant 0 : index
    %3 = vector.load %arg3[%c0_3, %c0_4] : memref<64x128xf32, #tpu.memory_space<vmem>>, vector<64x128xf32>
    tpu.vector_store %arg3[%c0_3, %c0_4], %2 {strides = array<i32>} : memref<64x128xf32, #tpu.memory_space<vmem>>, vector<64x128xf32>,
    %4 = tpu.iota {dimensions = array<i32: 0>} : vector<64x128xi32>
    %c64_i32 = arith.constant 64 : i32
    %5 = arith.muli %arg0, %c64_i32 : i32
    %6 = vector.broadcast %5 : i32 to vector<64x128xi32>
    %7 = arith.addi %4, %6 : vector<64x128xi32>
    %c200_i32 = arith.constant 200 : i32
    %8 = vector.broadcast %c200_i32 : i32 to vector<64x128xi32>
    %9 = arith.cmpi slt, %7, %8 : vector<64x128xi32>
    %cst_5 = arith.constant 0.000000e+00 : f32
    %10 = vector.broadcast %cst_5 : f32 to vector<64x128xf32>
    %11 = arith.select %9, %2, %10 : vector<64x128xi1>, vector<64x128xf32>
    %cst_6 = arith.constant dense<0.000000e+00> : vector<128xf32>
    %12 = vector.multi_reduction <add>, %11, %cst_6 [0] : vector<64x128xf32> to vector<128xf32>
    %13 = vector.shape_cast %12 : vector<128xf32> to vector<1x128xf32>
    %14 = arith.mulf %11, %11 : vector<64x128xf32>
    %cst_7 = arith.constant dense<0.000000e+00> : vector<128xf32>
    %15 = vector.multi_reduction <add>, %14, %cst_7 [0] : vector<64x128xf32> to vector<128xf32>
    %16 = vector.shape_cast %15 : vector<128xf32> to vector<1x128xf32>
    %17 = tpu.concatenate %13, %16 in 0 : vector<1x128xf32>, vector<1x128xf32> -> vector<2x128xf32>
    %c0_i32 = arith.constant 0 : i32
    %18 = arith.cmpi eq, %arg0, %c0_i32 : i32
    %19 = arith.extui %18 : i1 to i32
    %c0_i32_8 = arith.constant 0 : i32
    %20 = arith.cmpi ne, %19, %c0_i32_8 : i32
    scf.if %20 {
      %cst_13 = arith.constant 0.000000e+00 : f32
      %24 = vector.broadcast %cst_13 : f32 to vector<2x128xf32>
      %c0_14 = arith.constant 0 : index
      %c0_15 = arith.constant 0 : index
      %25 = vector.load %arg4[%c0_14, %c0_15] : memref<2x128xf32, #tpu.memory_space<vmem>>, vector<2x128xf32>
      tpu.vector_store %arg4[%c0_14, %c0_15], %24 {strides = array<i32>} : memref<2x128xf32, #tpu.memory_space<vmem>>, vector<2x128xf32>,
    } else {
    }
    %c0_9 = arith.constant 0 : index
    %c0_10 = arith.constant 0 : index
    %21 = vector.load %arg4[%c0_9, %c0_10] : memref<2x128xf32, #tpu.memory_space<vmem>>, vector<2x128xf32>
    %22 = arith.addf %21, %17 : vector<2x128xf32>
    %c0_11 = arith.constant 0 : index
    %c0_12 = arith.constant 0 : index
    %23 = vector.load %arg4[%c0_11, %c0_12] : memref<2x128xf32, #tpu.memory_space<vmem>>, vector<2x128xf32>
    tpu.vector_store %arg4[%c0_11, %c0_12], %22 {strides = array<i32>} : memref<2x128xf32, #tpu.memory_space<vmem>>, vector<2x128xf32>,
    return
  }
  func.func @transform_0(%arg0: i32) -> (i32, i32) {
    %c0_i32 = arith.constant 0 : i32
    %c0_i32_0 = arith.constant 0 : i32
    return %arg0, %c0_i32 : i32, i32
  }
  func.func @transform_1(%arg0: i32) -> (i32, i32) {
    %c0_i32 = arith.constant 0 : i32
    %c0_i32_0 = arith.constant 0 : i32
    %c0_i32_1 = arith.constant 0 : i32
    return %c0_i32, %c0_i32_0 : i32, i32
  }
  func.func @transform_2(%arg0: i32) -> (i32, i32) {
    %c0_i32 = arith.constant 0 : i32
    %c0_i32_0 = arith.constant 0 : i32
    return %arg0, %c0_i32 : i32, i32
  }
  func.func @transform_3(%arg0: i32) -> (i32, i32) {
    %c0_i32 = arith.constant 0 : i32
    %c0_i32_0 = arith.constant 0 : i32
    %c0_i32_1 = arith.constant 0 : i32
    return %c0_i32, %c0_i32_0 : i32, i32
  }
}

module attributes {stable_mosaic.version = 11 : i64} {
  func.func @_norm_matmul_kernel(%arg0: i32, %arg1: memref<2x128xf32, #tpu.memory_space<vmem>>, %arg2: memref<64x128xf32, #tpu.memory_space<vmem>>, %arg3: memref<128x128xbf16, #tpu.memory_space<vmem>>, %arg4: memref<64x128xf32, #tpu.memory_space<vmem>>, %arg5: memref<2x128xf32, #tpu.memory_space<vmem>>) attributes {dimension_semantics = [#tpu.dimension_semantics<arbitrary>], iteration_bounds = array<i64: 4>, scalar_prefetch = 0 : i64, scratch_operands = 0 : i64, tpu.core_type = #tpu.core_type<tc>, window_params = [{pipeline_mode = #tpu.pipeline_mode<synchronous>, transform_indices = @transform_0, window_bounds = array<i64: 2, 128>}, {transform_indices = @transform_1, window_bounds = array<i64: 64, 128>}, {pipeline_mode = #tpu.pipeline_mode<synchronous>, transform_indices = @transform_2, window_bounds = array<i64: 128, 128>}, {transform_indices = @transform_3, window_bounds = array<i64: 64, 128>}, {pipeline_mode = #tpu.pipeline_mode<synchronous>, transform_indices = @transform_4, window_bounds = array<i64: 2, 128>}]} {
    %c0 = arith.constant 0 : index
    %c0_0 = arith.constant 0 : index
    %0 = vector.load %arg1[%c0, %c0_0] : memref<2x128xf32, #tpu.memory_space<vmem>>, vector<2x128xf32>
    %c0_1 = arith.constant 0 : index
    %c0_2 = arith.constant 0 : index
    %1 = vector.load %arg2[%c0_1, %c0_2] : memref<64x128xf32, #tpu.memory_space<vmem>>, vector<64x128xf32>
    %2 = vector.extract_strided_slice %0 {offsets = [0, 0], sizes = [1, 128], strides = [1, 1]} : vector<2x128xf32> to vector<1x128xf32>
    %3 = vector.broadcast %2 : vector<1x128xf32> to vector<64x128xf32>
    %4 = arith.mulf %1, %3 : vector<64x128xf32>
    %5 = vector.extract_strided_slice %0 {offsets = [1, 0], sizes = [1, 128], strides = [1, 1]} : vector<2x128xf32> to vector<1x128xf32>
    %6 = vector.broadcast %5 : vector<1x128xf32> to vector<64x128xf32>
    %7 = arith.addf %4, %6 : vector<64x128xf32>
    %cst = arith.constant 0.000000e+00 : f32
    %8 = vector.broadcast %cst : f32 to vector<64x128xf32>
    %9 = arith.maximumf %7, %8 : vector<64x128xf32>
    %10 = arith.truncf %9 : vector<64x128xf32> to vector<64x128xbf16>
    %c0_3 = arith.constant 0 : index
    %c0_4 = arith.constant 0 : index
    %11 = vector.load %arg3[%c0_3, %c0_4] : memref<128x128xbf16, #tpu.memory_space<vmem>>, vector<128x128xbf16>
    %cst_5 = arith.constant dense<0.000000e+00> : vector<64x128xf32>
    %12 = tpu.matmul %10, %11, %cst_5 {dimension_numbers = #tpu.dot_dimension_numbers<[1], [0], [0], [1], [0, 0, 1, 1], [], []>} : vector<64x128xbf16>, vector<128x128xbf16>, vector<64x128xf32> -> vector<64x128xf32>
    %c0_6 = arith.constant 0 : index
    %c0_7 = arith.constant 0 : index
    %13 = vector.load %arg4[%c0_6, %c0_7] : memref<64x128xf32, #tpu.memory_space<vmem>>, vector<64x128xf32>
    tpu.vector_store %arg4[%c0_6, %c0_7], %12 {strides = array<i32>} : memref<64x128xf32, #tpu.memory_space<vmem>>, vector<64x128xf32>,
    %14 = tpu.iota {dimensions = array<i32: 0>} : vector<64x128xi32>
    %c64_i32 = arith.constant 64 : i32
    %15 = arith.muli %arg0, %c64_i32 : i32
    %16 = vector.broadcast %15 : i32 to vector<64x128xi32>
    %17 = arith.addi %14, %16 : vector<64x128xi32>
    %c200_i32 = arith.constant 200 : i32
    %18 = vector.broadcast %c200_i32 : i32 to vector<64x128xi32>
    %19 = arith.cmpi slt, %17, %18 : vector<64x128xi32>
    %cst_8 = arith.constant 0.000000e+00 : f32
    %20 = vector.broadcast %cst_8 : f32 to vector<64x128xf32>
    %21 = arith.select %19, %12, %20 : vector<64x128xi1>, vector<64x128xf32>
    %cst_9 = arith.constant dense<0.000000e+00> : vector<128xf32>
    %22 = vector.multi_reduction <add>, %21, %cst_9 [0] : vector<64x128xf32> to vector<128xf32>
    %23 = vector.shape_cast %22 : vector<128xf32> to vector<1x128xf32>
    %24 = arith.mulf %21, %21 : vector<64x128xf32>
    %cst_10 = arith.constant dense<0.000000e+00> : vector<128xf32>
    %25 = vector.multi_reduction <add>, %24, %cst_10 [0] : vector<64x128xf32> to vector<128xf32>
    %26 = vector.shape_cast %25 : vector<128xf32> to vector<1x128xf32>
    %27 = tpu.concatenate %23, %26 in 0 : vector<1x128xf32>, vector<1x128xf32> -> vector<2x128xf32>
    %c0_i32 = arith.constant 0 : i32
    %28 = arith.cmpi eq, %arg0, %c0_i32 : i32
    %29 = arith.extui %28 : i1 to i32
    %c0_i32_11 = arith.constant 0 : i32
    %30 = arith.cmpi ne, %29, %c0_i32_11 : i32
    scf.if %30 {
      %cst_16 = arith.constant 0.000000e+00 : f32
      %34 = vector.broadcast %cst_16 : f32 to vector<2x128xf32>
      %c0_17 = arith.constant 0 : index
      %c0_18 = arith.constant 0 : index
      %35 = vector.load %arg5[%c0_17, %c0_18] : memref<2x128xf32, #tpu.memory_space<vmem>>, vector<2x128xf32>
      tpu.vector_store %arg5[%c0_17, %c0_18], %34 {strides = array<i32>} : memref<2x128xf32, #tpu.memory_space<vmem>>, vector<2x128xf32>,
    } else {
    }
    %c0_12 = arith.constant 0 : index
    %c0_13 = arith.constant 0 : index
    %31 = vector.load %arg5[%c0_12, %c0_13] : memref<2x128xf32, #tpu.memory_space<vmem>>, vector<2x128xf32>
    %32 = arith.addf %31, %27 : vector<2x128xf32>
    %c0_14 = arith.constant 0 : index
    %c0_15 = arith.constant 0 : index
    %33 = vector.load %arg5[%c0_14, %c0_15] : memref<2x128xf32, #tpu.memory_space<vmem>>, vector<2x128xf32>
    tpu.vector_store %arg5[%c0_14, %c0_15], %32 {strides = array<i32>} : memref<2x128xf32, #tpu.memory_space<vmem>>, vector<2x128xf32>,
    return
  }
  func.func @transform_0(%arg0: i32) -> (i32, i32) {
    %c0_i32 = arith.constant 0 : i32
    %c0_i32_0 = arith.constant 0 : i32
    %c0_i32_1 = arith.constant 0 : i32
    return %c0_i32, %c0_i32_0 : i32, i32
  }
  func.func @transform_1(%arg0: i32) -> (i32, i32) {
    %c0_i32 = arith.constant 0 : i32
    %c0_i32_0 = arith.constant 0 : i32
    return %arg0, %c0_i32 : i32, i32
  }
  func.func @transform_2(%arg0: i32) -> (i32, i32) {
    %c0_i32 = arith.constant 0 : i32
    %c0_i32_0 = arith.constant 0 : i32
    %c0_i32_1 = arith.constant 0 : i32
    return %c0_i32, %c0_i32_0 : i32, i32
  }
  func.func @transform_3(%arg0: i32) -> (i32, i32) {
    %c0_i32 = arith.constant 0 : i32
    %c0_i32_0 = arith.constant 0 : i32
    return %arg0, %c0_i32 : i32, i32
  }
  func.func @transform_4(%arg0: i32) -> (i32, i32) {
    %c0_i32 = arith.constant 0 : i32
    %c0_i32_0 = arith.constant 0 : i32
    %c0_i32_1 = arith.constant 0 : i32
    return %c0_i32, %c0_i32_0 : i32, i32
  }
}

module attributes {stable_mosaic.version = 11 : i64} {
  func.func @_norm_tanh_kernel(%arg0: i32, %arg1: memref<2x128xf32, #tpu.memory_space<vmem>>, %arg2: memref<64x128xf32, #tpu.memory_space<vmem>>, %arg3: memref<64x128xf32, #tpu.memory_space<vmem>>) attributes {dimension_semantics = [#tpu.dimension_semantics<parallel>], iteration_bounds = array<i64: 4>, scalar_prefetch = 0 : i64, scratch_operands = 0 : i64, tpu.core_type = #tpu.core_type<tc>, window_params = [{pipeline_mode = #tpu.pipeline_mode<synchronous>, transform_indices = @transform_0, window_bounds = array<i64: 2, 128>}, {transform_indices = @transform_1, window_bounds = array<i64: 64, 128>}, {transform_indices = @transform_2, window_bounds = array<i64: 64, 128>}]} {
    %c0 = arith.constant 0 : index
    %c0_0 = arith.constant 0 : index
    %0 = vector.load %arg1[%c0, %c0_0] : memref<2x128xf32, #tpu.memory_space<vmem>>, vector<2x128xf32>
    %c0_1 = arith.constant 0 : index
    %c0_2 = arith.constant 0 : index
    %1 = vector.load %arg2[%c0_1, %c0_2] : memref<64x128xf32, #tpu.memory_space<vmem>>, vector<64x128xf32>
    %2 = vector.extract_strided_slice %0 {offsets = [0, 0], sizes = [1, 128], strides = [1, 1]} : vector<2x128xf32> to vector<1x128xf32>
    %3 = vector.broadcast %2 : vector<1x128xf32> to vector<64x128xf32>
    %4 = arith.mulf %1, %3 : vector<64x128xf32>
    %5 = vector.extract_strided_slice %0 {offsets = [1, 0], sizes = [1, 128], strides = [1, 1]} : vector<2x128xf32> to vector<1x128xf32>
    %6 = vector.broadcast %5 : vector<1x128xf32> to vector<64x128xf32>
    %7 = arith.addf %4, %6 : vector<64x128xf32>
    %cst = arith.constant 5.000000e-01 : f32
    %8 = vector.broadcast %cst : f32 to vector<64x128xf32>
    %9 = arith.mulf %8, %7 : vector<64x128xf32>
    %10 = math.tanh %9 : vector<64x128xf32>
    %cst_3 = arith.constant 3.14159274 : f32
    %11 = vector.broadcast %cst_3 : f32 to vector<64x128xf32>
    %12 = arith.mulf %11, %10 : vector<64x128xf32>
    %c0_4 = arith.constant 0 : index
    %c0_5 = arith.constant 0 : index
    %13 = vector.load %arg3[%c0_4, %c0_5] : memref<64x128xf32, #tpu.memory_space<vmem>>, vector<64x128xf32>
    tpu.vector_store %arg3[%c0_4, %c0_5], %12 {strides = array<i32>} : memref<64x128xf32, #tpu.memory_space<vmem>>, vector<64x128xf32>,
    return
  }
  func.func @transform_0(%arg0: i32) -> (i32, i32) {
    %c0_i32 = arith.constant 0 : i32
    %c0_i32_0 = arith.constant 0 : i32
    %c0_i32_1 = arith.constant 0 : i32
    return %c0_i32, %c0_i32_0 : i32, i32
  }
  func.func @transform_1(%arg0: i32) -> (i32, i32) {
    %c0_i32 = arith.constant 0 : i32
    %c0_i32_0 = arith.constant 0 : i32
    return %arg0, %c0_i32 : i32, i32
  }
  func.func @transform_2(%arg0: i32) -> (i32, i32) {
    %c0_i32 = arith.constant 0 : i32
    %c0_i32_0 = arith.constant 0 : i32
    return %arg0, %c0_i32 : i32, i32
  }
}

</mosaic_0001>

<bundles_post_ra>
// kernel: phi_wrf_forward.6
= control target key start
LH: loop header
LB: loop body
LE: loop exit
PB: predicated region body
PF: predicated region fallthrough
CT: control target
= control target key end

     0   :  { %s647_s15 = smov 0   ;;  %s744_s0 = inlined_call_operand.vmem [shape: f32[2,128], index: 0, kind: input, shape index: {}]   ;;  %s745_s1 = inlined_call_operand.vmem [shape: f32[256,128], index: 1, kind: input, shape index: {}]   ;;  %s746_s2 = inlined_call_operand.vmem [shape: bf16[128,128], index: 2, kind: input, shape index: {}]   ;;  %s747_s3 = inlined_call_operand.vmem [shape: f32[256,128], index: 3, kind: output, shape index: {0}]   ;;  %s748_s4 = inlined_call_operand.vmem [shape: f32[2,128], index: 4, kind: output, shape index: {1}]  }
   0x1 LB: > { %s653_s16 = sadd.s32 4294967295, %s619_s15   ;;  %p527_p0 = scmp.ge.s32.totalorder %s619_s15, 1  ;;  %s619_s15 = sphi %s647_s15, %s15_s15  }
   0x2   : > { %p161_p1 = scmp.lt.s32.totalorder %s619_s15, 5 }
   0x4   : > { %p162_p2 = pnand %p527_p0, %p161_p1 }
   0x5   : > { %s528_s19 = sshll.u32 (!%p162_p2), %s653_s16, 3  ;;  %s540_s14 = sshll.u32 (!%p162_p2), %s653_s16, 6 }
   0x6   : > { %165 = sbr.rel (%p162_p2) target bundleno = 285 (0x11d), region = 32  ;;  %p188_p3 = scmp.lt.s32.totalorder (!%p162_p2), %s528_s19, 31 }
   0x7   : > { %p541_p4 = scmp.ne.s32.totalorder (!%p162_p2), %s653_s16, 0 }
   0xb   : > { %v605_v0 = vld [vmem:[%s746_s2 + $0x38] sm:$0xff]   ;;  %v209_v1 = vlaneseq  ;;  %v606_v2 = vld [vmem:[%s746_s2 + $0x30] sm:$0xff]   ;;  %s750_s19 = smov (!%p188_p3, %s528_s19), 31  ;;  %v607_v4 = vld [vmem:[%s746_s2 + $0x28] sm:$0xff]   ;;  %v392_v53 = vstv %s540_s14  ;;  %vm451_vm8 = vcmask 1040384  }
   0xc   : > { %556 = vmatprep.subr.bf16.mxu0 %v605_v0  ;;  %580 = vmatprep.subr.bf16.mxu1 %v605_v0  ;;  %s529_s24 = sshll.u32 %s750_s19, 3  ;;  %v608_v7 = vld [vmem:[%s746_s2 + $0x20] sm:$0xff]   ;;  %v609_v17 = vld [vmem:[%s746_s2 + $0x18] sm:$0xff]   ;;  %v610_v30 = vld [vmem:[%s746_s2 + $0x10] sm:$0xff]  }
   0xd   : > { %v664_v3 = vshrl.u32 %v209_v1, 7  ;;  %557 = vmatpush3.bf16.msra.mxu0 %v605_v0  ;;  %588 = vmatpush3.bf16.msra.mxu1 %v605_v0  ;;  %s678_s27 = scalar_lea.vmem %s745_s1, %s529_s24  ;;  %v200_v8 = vld [vmem:[%s744_s0] sm:$0x3]  ;;  %v611_v39 = vld [vmem:[%s746_s2 + $0x8] sm:$0xff]   ;;  %s715_s20 = scalar_lea.vmem %s747_s3, %s529_s24 }
   0xe   : > { %558 = vmatprep.subr.bf16.mxu0 %v606_v2  ;;  %581 = vmatprep.subr.bf16.mxu1 %v606_v2  ;;  %v201_v9 = vld [vmem:[%s678_s27] sm:$0xff]  ;;  %v202_v10 = vld [vmem:[%s678_s27 + $0x8] sm:$0xff]  ;;  %v203_v22 = vld [vmem:[%s678_s27 + $0x10] sm:$0xff] }
   0xf   : > { %v211_v5 = vsub.s32 0, %v664_v3  ;;  %v223_v6 = vsub.s32 1, %v664_v3  ;;  %v205_v13 = vld [vmem:[%s678_s27 + $0x20] sm:$0xff]  ;;  %v206_v14 = vld [vmem:[%s678_s27 + $0x28] sm:$0xff]  ;;  %v204_v27 = vld [vmem:[%s678_s27 + $0x18] sm:$0xff]  ;;  %v385_v51 = vadd.s32 16, %v664_v3  ;;  %v393_v54 = vadd.s32 %v392_v53, %v664_v3 }
  0x10   : > { %v207_v28 = vld [vmem:[%s678_s27 + $0x30] sm:$0xff]  ;;  %v208_v29 = vld [vmem:[%s678_s27 + $0x38] sm:$0xff]  ;;  %v612_v44 = vld [vmem:[%s746_s2] sm:$0xff]   ;;  %v384_v52 = vadd.s32 8, %v664_v3  ;;  %v386_v55 = vadd.s32 24, %v664_v3  ;;  %v387_v59 = vadd.s32 32, %v664_v3 }
  0x11   : > { %559 = vmatpush3.bf16.msra.mxu0 %v606_v2  ;;  %589 = vmatpush3.bf16.msra.mxu1 %v606_v2  ;;  %v212_v11 = vrot.slane %v200_v8, %v211_v5  ;;  %v224_v12 = vrot.slane %v200_v8, %v223_v6  ;;  %v395_v57 = vadd.s32 %v392_v53, %v385_v51  ;;  %vm401_vm0 = vcmp.lt.s32.totalorder %v393_v54, 200 }
  0x12   : > { %560 = vmatprep.subr.bf16.mxu0 %v607_v4  ;;  %582 = vmatprep.subr.bf16.mxu1 %v607_v4  ;;  %v394_v60 = vadd.s32 %v392_v53, %v384_v52  ;;  %v396_v62 = vadd.s32 %v392_v53, %v386_v55  ;;  %v388_v0 = vadd.s32 40, %v664_v3  ;;  %v389_v1 = vadd.s32 48, %v664_v3 }
  0x13   : > { %v213_v15 = vmul.f32 %v212_v11, %v201_v9  ;;  %v214_v16 = vmul.f32 %v212_v11, %v202_v10  ;;  %v217_v18 = vmul.f32 %v212_v11, %v205_v13  ;;  %v218_v19 = vmul.f32 %v212_v11, %v206_v14 }
  0x14   : > { %v215_v34 = vmul.f32 %v212_v11, %v203_v22  ;;  %v216_v35 = vmul.f32 %v212_v11, %v204_v27  ;;  %v219_v37 = vmul.f32 %v212_v11, %v207_v28  ;;  %v220_v38 = vmul.f32 %v212_v11, %v208_v29 }
  0x15   : > { %561 = vmatpush3.bf16.msra.mxu0 %v607_v4  ;;  %590 = vmatpush3.bf16.msra.mxu1 %v607_v4  ;;  %v225_v20 = vadd.f32 %v224_v12, %v213_v15  ;;  %v226_v21 = vadd.f32 %v224_v12, %v214_v16  ;;  %v229_v23 = vadd.f32 %v224_v12, %v217_v18  ;;  %vm403_vm1 = vcmp.lt.s32.totalorder %v395_v57, 200 }
  0x16   : > { %562 = vmatprep.subr.bf16.mxu0 %v608_v7  ;;  %583 = vmatprep.subr.bf16.mxu1 %v608_v7  ;;  %v230_v24 = vadd.f32 %v224_v12, %v218_v19  ;;  %v227_v40 = vadd.f32 %v224_v12, %v215_v34  ;;  %v228_v41 = vadd.f32 %v224_v12, %v216_v35  ;;  %vm402_vm2 = vcmp.lt.s32.totalorder %v394_v60, 200 }
  0x17   : > { %v233_v25 = vmax.f32 %v225_v20, 0.0  ;;  %v234_v26 = vmax.f32 %v226_v21, 0.0  ;;  %v237_v31 = vmax.f32 %v229_v23, 0.0  ;;  %v231_v42 = vadd.f32 %v224_v12, %v219_v37 }
  0x18   : > { %v238_v32 = vmax.f32 %v230_v24, 0.0  ;;  %v232_v43 = vadd.f32 %v224_v12, %v220_v38  ;;  %v235_v45 = vmax.f32 %v227_v40, 0.0  ;;  %v236_v46 = vmax.f32 %v228_v41, 0.0 }
  0x19   : > { %563 = vmatpush3.bf16.msra.mxu0 %v608_v7  ;;  %591 = vmatpush3.bf16.msra.mxu1 %v608_v7  ;;  %v241_v33 = vpack.c.bf16 %v234_v26, %v233_v25  ;;  %v239_v47 = vmax.f32 %v231_v42, 0.0  ;;  %v397_v4 = vadd.s32 %v392_v53, %v387_v59  ;;  %v390_v7 = vadd.s32 56, %v664_v3 }
  0x1a   : > { %564 = vmatprep.subr.bf16.mxu0 %v609_v17  ;;  %584 = vmatprep.subr.bf16.mxu1 %v609_v17  ;;  %v243_v36 = vpack.c.bf16 %v238_v32, %v237_v31  ;;  %v240_v48 = vmax.f32 %v232_v43, 0.0  ;;  %v242_v49 = vpack.c.bf16 %v236_v46, %v235_v45  ;;  %vm404_vm3 = vcmp.lt.s32.totalorder %v396_v62, 200 }
  0x1b   : > { %572 = vmatprep.mubr.bf16.mxu0 %v241_v33  ;;  %v398_v10 = vadd.s32 %v392_v53, %v388_v0  ;;  %v399_v12 = vadd.s32 %v392_v53, %v389_v1  ;;  %vm405_vm4 = vcmp.lt.s32.totalorder %v397_v4, 200  ;;  %v400_v18 = vadd.s32 %v392_v53, %v390_v7 }
  0x1c   : > { %576 = vmatprep.mubr.bf16.mxu1 %v243_v36  ;;  %v244_v50 = vpack.c.bf16 %v240_v48, %v239_v47 }
  0x1d   : > { %565 = vmatpush3.bf16.msra.mxu0 %v609_v17  ;;  %592 = vmatpush3.bf16.msra.mxu1 %v609_v17  ;;  %vm406_vm5 = vcmp.lt.s32.totalorder %v398_v10, 200  ;;  %vm407_vm6 = vcmp.lt.s32.totalorder %v399_v12, 200  ;;  %vm408_vm7 = vcmp.lt.s32.totalorder %v400_v18, 200 }
  0x1e   : > { %566 = vmatprep.subr.bf16.mxu0 %v610_v30  ;;  %585 = vmatprep.subr.bf16.mxu1 %v610_v30 }
  0x21   : > { %567 = vmatpush3.bf16.msra.mxu0 %v610_v30  ;;  %593 = vmatpush3.bf16.msra.mxu1 %v610_v30 }
  0x22   : > { %568 = vmatprep.subr.bf16.mxu0 %v611_v39  ;;  %586 = vmatprep.subr.bf16.mxu1 %v611_v39 }
  0x25   : > { %569 = vmatpush3.bf16.msra.mxu0 %v611_v39  ;;  %594 = vmatpush3.bf16.msra.mxu1 %v611_v39 }
  0x26   : > { %570 = vmatprep.subr.bf16.mxu0 %v612_v44  ;;  %587 = vmatprep.subr.bf16.mxu1 %v612_v44 }
  0x29   : > { %571 = vmatpush3.bf16.msra.mxu0 %v612_v44  ;;  %595 = vmatpush3.bf16.msra.mxu1 %v612_v44 }
  0x2c   : > { %573 = vmatmul.mubr.bf16.vlgmr.msra.gmra.mxu0 %v242_v49  ;;  %577 = vmatmul.mubr.bf16.vlgmr.msra.gmra.mxu1 %v244_v50 }
  0xec   : > { %v574_v56 = vpop.f32.mrf.mxu0  ;;  %v578_v58 = vpop.f32.mrf.mxu1 }
  0xed   : > { %376 = vst [vmem:[%s715_s20 + $0x10] sm:$0xff] %v574_v56  ;;  %380 = vst [vmem:[%s715_s20 + $0x30] sm:$0xff] %v578_v58  ;;  %v411_v11 = vsel %vm403_vm1, %v574_v56, 0.0  ;;  %v415_v29 = vsel %vm407_vm6, %v578_v58, 0.0 }
  0xee   : > { %v343_v61 = vpop.f32.mrf.mxu0  ;;  %v359_v63 = vpop.f32.mrf.mxu1  ;;  %v432_v19 = vmul.f32 %v411_v11, %v411_v11  ;;  %v436_v34 = vmul.f32 %v415_v29, %v415_v29 }
  0xef   : > { %374 = vst [vmem:[%s715_s20] sm:$0xff] %v343_v61  ;;  %378 = vst [vmem:[%s715_s20 + $0x20] sm:$0xff] %v359_v63  ;;  %v409_v6 = vsel %vm401_vm0, %v343_v61, 0.0  ;;  %v413_v3 = vsel %vm405_vm4, %v359_v63, 0.0 }
  0xf0   : > { %v575_v2 = vpop.f32.mrf.mxu0  ;;  %v579_v5 = vpop.f32.mrf.mxu1  ;;  %v430_v14 = vmul.f32 %v409_v6, %v409_v6  ;;  %v434_v26 = vmul.f32 %v413_v3, %v413_v3 }
  0xf1   : > { %377 = vst [vmem:[%s715_s20 + $0x18] sm:$0xff] %v575_v2  ;;  %381 = vst [vmem:[%s715_s20 + $0x38] sm:$0xff] %v579_v5  ;;  %v412_v17 = vsel %vm404_vm3, %v575_v2, 0.0  ;;  %v416_v33 = vsel %vm408_vm7, %v579_v5, 0.0 }
  0xf2   : > { %v346_v8 = vpop.f32.mrf.mxu0  ;;  %v362_v9 = vpop.f32.mrf.mxu1  ;;  %v433_v22 = vmul.f32 %v412_v17, %v412_v17  ;;  %v437_v37 = vmul.f32 %v416_v33, %v416_v33 }
  0xf3   : > { %375 = vst [vmem:[%s715_s20 + $0x8] sm:$0xff] %v346_v8  ;;  %v410_v13 = vsel %vm402_vm2, %v346_v8, 0.0  ;;  %379 = vst [vmem:[%s715_s20 + $0x28] sm:$0xff] %v362_v9  ;;  %v414_v25 = vsel %vm406_vm5, %v362_v9, 0.0 }
  0xf4   : > { %v417_v15 = vadd.f32 %v410_v13, %v409_v6  ;;  %v431_v16 = vmul.f32 %v410_v13, %v410_v13  ;;  %v435_v31 = vmul.f32 %v414_v25, %v414_v25 }
  0xf6   : > { %v418_v20 = vadd.f32 %v417_v15, %v411_v11  ;;  %v438_v21 = vadd.f32 %v431_v16, %v430_v14 }
  0xf8   : > { %v439_v23 = vadd.f32 %v438_v21, %v432_v19  ;;  %v419_v24 = vadd.f32 %v418_v20, %v412_v17 }
  0xfa   : > { %v420_v27 = vadd.f32 %v419_v24, %v413_v3  ;;  %v440_v28 = vadd.f32 %v439_v23, %v433_v22 }
  0xfc   : > { %v421_v30 = vadd.f32 %v420_v27, %v414_v25  ;;  %v441_v32 = vadd.f32 %v440_v28, %v434_v26 }
  0xfe   : > { %v422_v35 = vadd.f32 %v421_v30, %v415_v29  ;;  %v442_v36 = vadd.f32 %v441_v32, %v435_v31 }
 0x100   : > { %v423_v38 = vadd.f32 %v422_v35, %v416_v33  ;;  %v443_v39 = vadd.f32 %v442_v36, %v436_v34 }
 0x102   : > { %v424_v40 = vrot.slane %v423_v38, 4  ;;  %v444_v41 = vadd.f32 %v443_v39, %v437_v37 }
 0x104   : > { %v425_v42 = vadd.f32 %v424_v40, %v423_v38  ;;  %v445_v43 = vrot.slane %v444_v41, 4 }
 0x106   : > { %v426_v44 = vrot.slane %v425_v42, 2  ;;  %v446_v45 = vadd.f32 %v445_v43, %v444_v41 }
 0x108   : > { %v427_v46 = vadd.f32 %v426_v44, %v425_v42  ;;  %v447_v47 = vrot.slane %v446_v45, 2 }
 0x10a   : > { %v428_v48 = vrot.slane %v427_v46, 1  ;;  %v448_v49 = vadd.f32 %v447_v47, %v446_v45 }
 0x10c   : > { %v449_v50 = vrot.slane %v448_v49, 1  ;;  %v429_v51 = vadd.f32 %v428_v48, %v427_v46  ;;  %456 = sbr.rel (%p541_p4) target bundleno = 275 (0x113), region = 36 }
 0x10e   : > { %v450_v52 = vadd.f32 %v449_v50, %v448_v49 }
 0x110   : > { %v452_v53 = vsel %vm451_vm8, %v429_v51, %v450_v52 }
 0x111   : > { %v621_v54 = vmov 0.0  }
 0x112   : > { %457 = vst [vmem:[%s748_s4] sm:$0x3] %v621_v54 }
 0x113 PF:  {}
 0x119   : > { %v458_v55 = vld [vmem:[%s748_s4] sm:$0x3] }
 0x11a   : > { %v459_v56 = vadd.f32 %v458_v55, %v452_v53 }
 0x11c   : > { %460 = vst [vmem:[%s748_s4] sm:$0x3] %v459_v56 }
 0x11d PF: > { %s15_s15 = sadd.s32 1, %s619_s15  }
 0x11e   : > { %p12_p5 = scmp.ge.s32.totalorder %s15_s15, 6  }
 0x120   :  { %14 = sbr.rel (!%p12_p5) target bundleno = 1 (0x1), region = 74 }

// kernel: phi_wrf_forward.5
= control target key start
LH: loop header
LB: loop body
LE: loop exit
PB: predicated region body
PF: predicated region fallthrough
CT: control target
= control target key end

     0   :  { %s727_s12 = smov 0   ;;  %s834_s0 = inlined_call_operand.vmem [shape: bf16[256,256], index: 0, kind: input, shape index: {}]   ;;  %s835_s1 = inlined_call_operand.vmem [shape: bf16[256,128], index: 1, kind: input, shape index: {}]   ;;  %s836_s2 = inlined_call_operand.vmem [shape: f32[256,128], index: 2, kind: output, shape index: {0}]   ;;  %s837_s3 = inlined_call_operand.vmem [shape: f32[2,128], index: 3, kind: output, shape index: {1}]  }
   0x1 LB: > { %s733_s13 = sadd.s32 4294967295, %s704_s12   ;;  %p570_p0 = scmp.ge.s32.totalorder %s704_s12, 1  ;;  %s704_s12 = sphi %s727_s12, %s14_s12  }
   0x2   : > { %p137_p1 = scmp.lt.s32.totalorder %s704_s12, 5 }
   0x4   : > { %p138_p2 = pnand %p570_p0, %p137_p1 }
   0x5   : > { %s571_s16 = sshll.u32 (!%p138_p2), %s733_s13, 3  ;;  %s600_s27 = sshll.u32 (!%p138_p2), %s733_s13, 6 }
   0x6   : > { %141 = sbr.rel (%p138_p2) target bundleno = 291 (0x123), region = 28  ;;  %p163_p3 = scmp.lt.s32.totalorder (!%p138_p2), %s571_s16, 31 }
   0x7   : > { %p601_p4 = scmp.ne.s32.totalorder (!%p138_p2), %s733_s13, 0 }
   0xb   : > { %v670_v0 = vld [vmem:[%s835_s1 + $0x78] sm:$0xff]   ;;  %v672_v2 = vld [vmem:[%s835_s1 + $0x70] sm:$0xff]   ;;  %v674_v4 = vld [vmem:[%s835_s1 + $0x68] sm:$0xff]   ;;  %s839_s16 = smov (!%p163_p3, %s571_s16), 31  ;;  %v425_v24 = vlaneseq  ;;  %v435_v29 = vstv %s600_s27  ;;  %vm494_vm8 = vcmask 1040384  }
   0xc   : > { %v671_v1 = vld [vmem:[%s835_s1 + $0x38] sm:$0xff]   ;;  %605 = vmatprep.subr.bf16.mxu0 %v670_v0  ;;  %645 = vmatprep.subr.bf16.mxu1 %v670_v0  ;;  %v673_v3 = vld [vmem:[%s835_s1 + $0x30] sm:$0xff]   ;;  %v675_v5 = vld [vmem:[%s835_s1 + $0x28] sm:$0xff]   ;;  %s604_s4 = sshll.u32 %s839_s16, 3 }
   0xd   : > { %606 = vmatpush3.bf16.msra.mxu0 %v671_v1  ;;  %653 = vmatpush3.bf16.msra.mxu1 %v671_v1  ;;  %v676_v6 = vld [vmem:[%s835_s1 + $0x60] sm:$0xff]   ;;  %v678_v8 = vld [vmem:[%s835_s1 + $0x58] sm:$0xff]   ;;  %s773_s9 = scalar_lea.vmem %s834_s0, %s604_s4  ;;  %v680_v10 = vld [vmem:[%s835_s1 + $0x50] sm:$0xff]   ;;  %v426_v25 = vshrl.u32 %v425_v24, 7  ;;  %s810_s30 = scalar_lea.vmem %s836_s2, %s604_s4 }
   0xe   : > { %607 = vmatprep.subr.bf16.mxu0 %v672_v2  ;;  %646 = vmatprep.subr.bf16.mxu1 %v672_v2  ;;  %v677_v7 = vld [vmem:[%s835_s1 + $0x20] sm:$0xff]   ;;  %v679_v9 = vld [vmem:[%s835_s1 + $0x18] sm:$0xff]   ;;  %v681_v13 = vld [vmem:[%s835_s1 + $0x10] sm:$0xff]  }
   0xf   : > { %v688_v11 = vld [vmem:[%s773_s9 + $0x4] ss:$8 sps:$4 sm:$0xff]   ;;  %v686_v18 = vld [vmem:[%s773_s9] ss:$8 sps:$4 sm:$0xff]   ;;  %v692_v20 = vld [vmem:[%s773_s9 + $0x14] ss:$8 sps:$4 sm:$0xff]   ;;  %v436_v36 = vadd.s32 %v435_v29, %v426_v25 }
  0x10   : > { %v691_v12 = vld [vmem:[%s773_s9 + $0x24] ss:$8 sps:$4 sm:$0xff]   ;;  %384 = vmatprep.mubr.bf16.mxu0 %v688_v11  ;;  %v689_v19 = vld [vmem:[%s773_s9 + $0x20] ss:$8 sps:$4 sm:$0xff]   ;;  %v695_v21 = vld [vmem:[%s773_s9 + $0x34] ss:$8 sps:$4 sm:$0xff]  }
  0x11   : > { %608 = vmatpush3.bf16.msra.mxu0 %v673_v3  ;;  %654 = vmatpush3.bf16.msra.mxu1 %v673_v3  ;;  %v682_v14 = vld [vmem:[%s835_s1 + $0x48] sm:$0xff]   ;;  %v684_v16 = vld [vmem:[%s835_s1 + $0x40] sm:$0xff]   ;;  %v694_v22 = vld [vmem:[%s773_s9 + $0x10] ss:$8 sps:$4 sm:$0xff]   ;;  %v427_v26 = vadd.s32 8, %v426_v25  ;;  %v428_v33 = vadd.s32 16, %v426_v25 }
  0x12   : > { %609 = vmatprep.subr.bf16.mxu0 %v674_v4  ;;  %647 = vmatprep.subr.bf16.mxu1 %v674_v4  ;;  %v683_v15 = vld [vmem:[%s835_s1 + $0x8] sm:$0xff]   ;;  %v685_v17 = vld [vmem:[%s835_s1] sm:$0xff]   ;;  %v697_v23 = vld [vmem:[%s773_s9 + $0x30] ss:$8 sps:$4 sm:$0xff]   ;;  %v430_v39 = vadd.s32 32, %v426_v25  ;;  %v429_v43 = vadd.s32 24, %v426_v25 }
  0x13   : > { %400 = vmatprep.mubr.bf16.mxu1 %v691_v12  ;;  %v437_v32 = vadd.s32 %v435_v29, %v427_v26  ;;  %v438_v42 = vadd.s32 %v435_v29, %v428_v33  ;;  %vm444_vm1 = vcmp.lt.s32.totalorder %v436_v36, 200  ;;  %v431_v47 = vadd.s32 40, %v426_v25 }
  0x14   : > { %v440_v49 = vadd.s32 %v435_v29, %v430_v39  ;;  %v432_v51 = vadd.s32 48, %v426_v25  ;;  %v439_v54 = vadd.s32 %v435_v29, %v429_v43  ;;  %v433_v62 = vadd.s32 56, %v426_v25 }
  0x15   : > { %610 = vmatpush3.bf16.msra.mxu0 %v675_v5  ;;  %655 = vmatpush3.bf16.msra.mxu1 %v675_v5  ;;  %vm445_vm0 = vcmp.lt.s32.totalorder %v437_v32, 200  ;;  %vm446_vm2 = vcmp.lt.s32.totalorder %v438_v42, 200  ;;  %v441_v59 = vadd.s32 %v435_v29, %v431_v47 }
  0x16   : > { %611 = vmatprep.subr.bf16.mxu0 %v676_v6  ;;  %648 = vmatprep.subr.bf16.mxu1 %v676_v6  ;;  %vm448_vm3 = vcmp.lt.s32.totalorder %v440_v49, 200  ;;  %v442_v0 = vadd.s32 %v435_v29, %v432_v51  ;;  %vm447_vm4 = vcmp.lt.s32.totalorder %v439_v54, 200 }
  0x17   : > { %vm449_vm5 = vcmp.lt.s32.totalorder %v441_v59, 200 }
  0x18   : > { %vm450_vm6 = vcmp.lt.s32.totalorder %v442_v0, 200 }
  0x19   : > { %612 = vmatpush3.bf16.msra.mxu0 %v677_v7  ;;  %656 = vmatpush3.bf16.msra.mxu1 %v677_v7 }
  0x1a   : > { %613 = vmatprep.subr.bf16.mxu0 %v678_v8  ;;  %649 = vmatprep.subr.bf16.mxu1 %v678_v8 }
  0x1d   : > { %614 = vmatpush3.bf16.msra.mxu0 %v679_v9  ;;  %657 = vmatpush3.bf16.msra.mxu1 %v679_v9 }
  0x1e   : > { %615 = vmatprep.subr.bf16.mxu0 %v680_v10  ;;  %650 = vmatprep.subr.bf16.mxu1 %v680_v10  ;;  %v443_v10 = vadd.s32 %v435_v29, %v433_v62 }
  0x20   : > { %vm451_vm7 = vcmp.lt.s32.totalorder %v443_v10, 200 }
  0x21   : > { %616 = vmatpush3.bf16.msra.mxu0 %v681_v13  ;;  %658 = vmatpush3.bf16.msra.mxu1 %v681_v13 }
  0x22   : > { %617 = vmatprep.subr.bf16.mxu0 %v682_v14  ;;  %651 = vmatprep.subr.bf16.mxu1 %v682_v14 }
  0x25   : > { %618 = vmatpush3.bf16.msra.mxu0 %v683_v15  ;;  %659 = vmatpush3.bf16.msra.mxu1 %v683_v15 }
  0x26   : > { %619 = vmatprep.subr.bf16.mxu0 %v684_v16  ;;  %652 = vmatprep.subr.bf16.mxu1 %v684_v16 }
  0x29   : > { %620 = vmatpush3.bf16.msra.mxu0 %v685_v17  ;;  %660 = vmatpush3.bf16.msra.mxu1 %v685_v17 }
  0x2c   : > { %385 = vmatmul.mubr.bf16.vlgmr.msra.gmra.mxu0 %v686_v18  ;;  %401 = vmatmul.mubr.bf16.vlgmr.msra.gmra.mxu1 %v689_v19 }
  0x2d   : > { %392 = vmatprep.mubr.bf16.mxu0 %v692_v20  ;;  %408 = vmatprep.mubr.bf16.mxu1 %v695_v21 }
  0x34   : > { %393 = vmatmul.mubr.bf16.gmra.mxu0 %v694_v22  ;;  %409 = vmatmul.mubr.bf16.gmra.mxu1 %v697_v23 }
  0xec   : > { %v621_v27 = vpop.f32.mrf.mxu0  ;;  %v633_v28 = vpop.f32.mrf.mxu1 }
  0xee   : > { %v622_v30 = vpop.f32.mrf.mxu0  ;;  %v634_v31 = vpop.f32.mrf.mxu1 }
  0xef   : > { %v623_v34 = vadd.f32 %v622_v30, %v621_v27  ;;  %v635_v35 = vadd.f32 %v634_v31, %v633_v28 }
  0xf0   : > { %v624_v37 = vpop.f32.mrf.mxu0  ;;  %v636_v38 = vpop.f32.mrf.mxu1 }
  0xf1   : > { %417 = vst [vmem:[%s810_s30] sm:$0xff] %v623_v34  ;;  %421 = vst [vmem:[%s810_s30 + $0x20] sm:$0xff] %v635_v35  ;;  %v452_v55 = vsel %vm444_vm1, %v623_v34, 0.0  ;;  %v456_v11 = vsel %vm448_vm3, %v635_v35, 0.0 }
  0xf2   : > { %v625_v40 = vpop.f32.mrf.mxu0  ;;  %v637_v41 = vpop.f32.mrf.mxu1  ;;  %v473_v1 = vmul.f32 %v452_v55, %v452_v55  ;;  %v477_v17 = vmul.f32 %v456_v11, %v456_v11 }
  0xf3   : > { %v626_v44 = vadd.f32 %v625_v40, %v624_v37  ;;  %v638_v45 = vadd.f32 %v637_v41, %v636_v38 }
  0xf4   : > { %v627_v46 = vpop.f32.mrf.mxu0  ;;  %v639_v48 = vpop.f32.mrf.mxu1 }
  0xf5   : > { %418 = vst [vmem:[%s810_s30 + $0x8] sm:$0xff] %v626_v44  ;;  %v453_v50 = vsel %vm445_vm0, %v626_v44, 0.0  ;;  %422 = vst [vmem:[%s810_s30 + $0x28] sm:$0xff] %v638_v45  ;;  %v457_v16 = vsel %vm449_vm5, %v638_v45, 0.0 }
  0xf6   : > { %v628_v52 = vpop.f32.mrf.mxu0  ;;  %v640_v53 = vpop.f32.mrf.mxu1  ;;  %v474_v58 = vmul.f32 %v453_v50, %v453_v50  ;;  %v460_v2 = vadd.f32 %v453_v50, %v452_v55  ;;  %v478_v21 = vmul.f32 %v457_v16, %v457_v16 }
  0xf7   : > { %v629_v56 = vadd.f32 %v628_v52, %v627_v46  ;;  %v641_v57 = vadd.f32 %v640_v53, %v639_v48 }
  0xf8   : > { %v630_v60 = vpop.f32.mrf.mxu0  ;;  %v642_v61 = vpop.f32.mrf.mxu1  ;;  %v481_v8 = vadd.f32 %v474_v58, %v473_v1 }
  0xf9   : > { %419 = vst [vmem:[%s810_s30 + $0x10] sm:$0xff] %v629_v56  ;;  %v454_v63 = vsel %vm446_vm2, %v629_v56, 0.0  ;;  %423 = vst [vmem:[%s810_s30 + $0x30] sm:$0xff] %v641_v57  ;;  %v458_v20 = vsel %vm450_vm6, %v641_v57, 0.0 }
  0xfa   : > { %v475_v3 = vmul.f32 %v454_v63, %v454_v63  ;;  %v631_v4 = vpop.f32.mrf.mxu0  ;;  %v643_v5 = vpop.f32.mrf.mxu1  ;;  %v461_v9 = vadd.f32 %v460_v2, %v454_v63  ;;  %v479_v25 = vmul.f32 %v458_v20, %v458_v20 }
  0xfb   : > { %v632_v6 = vadd.f32 %v631_v4, %v630_v60  ;;  %v644_v7 = vadd.f32 %v643_v5, %v642_v61 }
  0xfc   : > { %v482_v13 = vadd.f32 %v481_v8, %v475_v3 }
  0xfd   : > { %420 = vst [vmem:[%s810_s30 + $0x18] sm:$0xff] %v632_v6  ;;  %v455_v12 = vsel %vm447_vm4, %v632_v6, 0.0  ;;  %424 = vst [vmem:[%s810_s30 + $0x38] sm:$0xff] %v644_v7  ;;  %v459_v24 = vsel %vm451_vm7, %v644_v7, 0.0 }
  0xfe   : > { %v462_v14 = vadd.f32 %v461_v9, %v455_v12  ;;  %v476_v15 = vmul.f32 %v455_v12, %v455_v12  ;;  %v480_v29 = vmul.f32 %v459_v24, %v459_v24 }
 0x100   : > { %v463_v18 = vadd.f32 %v462_v14, %v456_v11  ;;  %v483_v19 = vadd.f32 %v482_v13, %v476_v15 }
 0x102   : > { %v484_v22 = vadd.f32 %v483_v19, %v477_v17  ;;  %v464_v23 = vadd.f32 %v463_v18, %v457_v16 }
 0x104   : > { %v465_v26 = vadd.f32 %v464_v23, %v458_v20  ;;  %v485_v27 = vadd.f32 %v484_v22, %v478_v21 }
 0x106   : > { %v466_v28 = vadd.f32 %v465_v26, %v459_v24  ;;  %v486_v30 = vadd.f32 %v485_v27, %v479_v25 }
 0x108   : > { %v467_v31 = vrot.slane %v466_v28, 4  ;;  %v487_v32 = vadd.f32 %v486_v30, %v480_v29 }
 0x10a   : > { %v468_v33 = vadd.f32 %v467_v31, %v466_v28  ;;  %v488_v34 = vrot.slane %v487_v32, 4 }
 0x10c   : > { %v469_v35 = vrot.slane %v468_v33, 2  ;;  %v489_v36 = vadd.f32 %v488_v34, %v487_v32 }
 0x10e   : > { %v470_v37 = vadd.f32 %v469_v35, %v468_v33  ;;  %v490_v38 = vrot.slane %v489_v36, 2 }
 0x110   : > { %v471_v39 = vrot.slane %v470_v37, 1  ;;  %v491_v40 = vadd.f32 %v490_v38, %v489_v36 }
 0x112   : > { %v492_v41 = vrot.slane %v491_v40, 1  ;;  %v472_v42 = vadd.f32 %v471_v39, %v470_v37  ;;  %499 = sbr.rel (%p601_p4) target bundleno = 281 (0x119), region = 32 }
 0x114   : > { %v493_v43 = vadd.f32 %v492_v41, %v491_v40 }
 0x116   : > { %v495_v44 = vsel %vm494_vm8, %v472_v42, %v493_v43 }
 0x117   : > { %v706_v45 = vmov 0.0  }
 0x118   : > { %500 = vst [vmem:[%s837_s3] sm:$0x3] %v706_v45 }
 0x119 PF:  {}
 0x11f   : > { %v501_v46 = vld [vmem:[%s837_s3] sm:$0x3] }
 0x120   : > { %v502_v47 = vadd.f32 %v501_v46, %v495_v44 }
 0x122   : > { %503 = vst [vmem:[%s837_s3] sm:$0x3] %v502_v47 }
 0x123 PF: > { %s14_s12 = sadd.s32 1, %s704_s12  }
 0x124   : > { %p11_p5 = scmp.ge.s32.totalorder %s14_s12, 6  }
 0x126   :  { %13 = sbr.rel (!%p11_p5) target bundleno = 1 (0x1), region = 70 }

// kernel: phi_wrf_forward.9
= control target key start
LH: loop header
LB: loop body
LE: loop exit
PB: predicated region body
PF: predicated region fallthrough
CT: control target
= control target key end

     0   :  { %s326_s9 = smov 0   ;;  %s353_s0 = inlined_call_operand.vmem [shape: f32[2,128], index: 0, kind: input, shape index: {}]   ;;  %s354_s1 = inlined_call_operand.vmem [shape: f32[256,128], index: 1, kind: input, shape index: {}]   ;;  %s355_s2 = inlined_call_operand.vmem [shape: f32[256,128], index: 2, kind: output, shape index: {}]  }
   0x1 LB: > { %s268_s10 = sadd.s32 4294967295, %s309_s9   ;;  %p272_p0 = scmp.ge.s32.totalorder %s309_s9, 1  ;;  %s309_s9 = sphi %s326_s9, %s12_s9  }
   0x2   : > { %p113_p1 = scmp.lt.s32.totalorder %s309_s9, 5 }
   0x4   : > { %p114_p2 = pnand %p272_p0, %p113_p1 }
   0x5   : > { %s273_s11 = sshll.u32 (!%p114_p2), %s268_s10, 3 }
   0x6   : > { %117 = sbr.rel (%p114_p2) target bundleno = 49 (0x31), region = 28  ;;  %p136_p3 = scmp.lt.s32.totalorder (!%p114_p2), %s273_s11, 31 }
   0xb   : > { %v156_v0 = vlaneseq  ;;  %s357_s11 = smov (!%p136_p3, %s273_s11), 31  ;;  %v147_v2 = vld [vmem:[%s353_s0] sm:$0x3] }
   0xc   : > { %s274_s14 = sshll.u32 %s357_s11, 3 }
   0xd   : > { %v157_v1 = vshrl.u32 %v156_v0, 7  ;;  %s139_s17 = scalar_lea.vmem %s354_s1, %s274_s14  ;;  %s145_s20 = scalar_lea.vmem %s355_s2, %s274_s14 }
   0xe   : > { %v148_v7 = vld [vmem:[%s139_s17] sm:$0xff]  ;;  %v149_v8 = vld [vmem:[%s139_s17 + $0x8] sm:$0xff]  ;;  %v150_v9 = vld [vmem:[%s139_s17 + $0x10] sm:$0xff] }
   0xf   : > { %v158_v3 = vsub.s32 0, %v157_v1  ;;  %v170_v4 = vsub.s32 1, %v157_v1  ;;  %v151_v13 = vld [vmem:[%s139_s17 + $0x18] sm:$0xff]  ;;  %v152_v14 = vld [vmem:[%s139_s17 + $0x20] sm:$0xff]  ;;  %v153_v15 = vld [vmem:[%s139_s17 + $0x28] sm:$0xff] }
  0x10   : > { %v154_v19 = vld [vmem:[%s139_s17 + $0x30] sm:$0xff]  ;;  %v155_v20 = vld [vmem:[%s139_s17 + $0x38] sm:$0xff] }
  0x11   : > { %v159_v5 = vrot.slane %v147_v2, %v158_v3  ;;  %v171_v6 = vrot.slane %v147_v2, %v170_v4 }
  0x13   : > { %v160_v10 = vmul.f32 %v159_v5, %v148_v7  ;;  %v161_v11 = vmul.f32 %v159_v5, %v149_v8  ;;  %v162_v12 = vmul.f32 %v159_v5, %v150_v9  ;;  %v163_v16 = vmul.f32 %v159_v5, %v151_v13 }
  0x14   : > { %v164_v17 = vmul.f32 %v159_v5, %v152_v14  ;;  %v165_v18 = vmul.f32 %v159_v5, %v153_v15  ;;  %v166_v24 = vmul.f32 %v159_v5, %v154_v19  ;;  %v167_v28 = vmul.f32 %v159_v5, %v155_v20 }
  0x15   : > { %v172_v21 = vadd.f32 %v171_v6, %v160_v10  ;;  %v173_v22 = vadd.f32 %v171_v6, %v161_v11  ;;  %v174_v23 = vadd.f32 %v171_v6, %v162_v12  ;;  %v175_v25 = vadd.f32 %v171_v6, %v163_v16 }
  0x16   : > { %v176_v26 = vadd.f32 %v171_v6, %v164_v17  ;;  %v177_v27 = vadd.f32 %v171_v6, %v165_v18  ;;  %v178_v32 = vadd.f32 %v171_v6, %v166_v24  ;;  %v179_v34 = vadd.f32 %v171_v6, %v167_v28 }
  0x17   : > { %v180_v29 = vmul.f32 0.5, %v172_v21  ;;  %v181_v30 = vmul.f32 0.5, %v173_v22  ;;  %v182_v31 = vmul.f32 0.5, %v174_v23  ;;  %v183_v33 = vmul.f32 0.5, %v175_v25 }
  0x18   : > { %v184_v35 = vmul.f32 0.5, %v176_v26  ;;  %v185_v36 = vmul.f32 0.5, %v177_v27  ;;  %v186_v37 = vmul.f32 0.5, %v178_v32  ;;  %v187_v38 = vmul.f32 0.5, %v179_v34 }
  0x19   : > { %287 = vtanh.f32 %v180_v29 }
  0x1a   : > { %289 = vtanh.f32 %v181_v30 }
  0x1b   : > { %291 = vtanh.f32 %v182_v31 }
  0x1c   : > { %293 = vtanh.f32 %v183_v33 }
  0x1d   : > { %295 = vtanh.f32 %v184_v35 }
  0x1e   : > { %297 = vtanh.f32 %v185_v36 }
  0x1f   : > { %299 = vtanh.f32 %v186_v37 }
  0x20   : > { %301 = vtanh.f32 %v187_v38 }
  0x26   : > { %v288_v39 = vpop.eup %287 }
  0x27   : > { %v290_v40 = vpop.eup %289  ;;  %v196_v41 = vmul.f32 3.1415927, %v288_v39 }
  0x28   : > { %v292_v42 = vpop.eup %291  ;;  %v197_v43 = vmul.f32 3.1415927, %v290_v40 }
  0x29   : > { %v294_v44 = vpop.eup %293  ;;  %204 = vst [vmem:[%s145_s20] sm:$0xff] %v196_v41  ;;  %v198_v45 = vmul.f32 3.1415927, %v292_v42 }
  0x2a   : > { %v296_v46 = vpop.eup %295  ;;  %205 = vst [vmem:[%s145_s20 + $0x8] sm:$0xff] %v197_v43  ;;  %v199_v47 = vmul.f32 3.1415927, %v294_v44 }
  0x2b   : > { %v298_v48 = vpop.eup %297  ;;  %206 = vst [vmem:[%s145_s20 + $0x10] sm:$0xff] %v198_v45  ;;  %v200_v49 = vmul.f32 3.1415927, %v296_v46 }
  0x2c   : > { %v300_v50 = vpop.eup %299  ;;  %207 = vst [vmem:[%s145_s20 + $0x18] sm:$0xff] %v199_v47  ;;  %v201_v51 = vmul.f32 3.1415927, %v298_v48 }
  0x2d   : > { %v302_v52 = vpop.eup %301  ;;  %208 = vst [vmem:[%s145_s20 + $0x20] sm:$0xff] %v200_v49  ;;  %v202_v53 = vmul.f32 3.1415927, %v300_v50 }
  0x2e   : > { %209 = vst [vmem:[%s145_s20 + $0x28] sm:$0xff] %v201_v51  ;;  %v203_v54 = vmul.f32 3.1415927, %v302_v52 }
  0x2f   : > { %210 = vst [vmem:[%s145_s20 + $0x30] sm:$0xff] %v202_v53 }
  0x30   : > { %211 = vst [vmem:[%s145_s20 + $0x38] sm:$0xff] %v203_v54 }
  0x31 PF: > { %s12_s9 = sadd.s32 1, %s309_s9  }
  0x32   : > { %p9_p4 = scmp.ge.s32.totalorder %s12_s9, 6  }
  0x34   :  { %11 = sbr.rel (!%p9_p4) target bundleno = 1 (0x1), region = 58 }

</bundles_post_ra>
